<compile_context>
chip_gen: v5e
topology: v5e:2x2
jax: 0.10.0
libtpu: 0.0.40
codegen_flags: <defaults>
</compile_context>

<pallas_src>
import functools

import jax
import jax.numpy as jnp
from jax.experimental import pallas as pl
from jax.experimental.pallas import tpu as pltpu


_BF16_SUBLANE = 16  # native sublane tile for bf16 operands


def _round_up(n, m):
    return ((n + m - 1) // m) * m


def dan_kernel(x_ref, w_ref, b_ref, out_ref):
    # Fused GEMM: (tb, d_embed) bf16 @ (d_embed, d_out) bf16 -> f32 accumulate,
    # plus bias. Unaligned K / N are fine: block dims equal the full array dims
    # and Mosaic masks the internally padded lanes/sublanes.
    logits = (
        jnp.dot(x_ref[...], w_ref[...], preferred_element_type=jnp.float32)
        + b_ref[...]
    )
    # Numerically stable log_softmax over the (unpadded) class axis, in f32.
    m = jnp.max(logits, axis=-1, keepdims=True)
    shifted = logits - m
    lse = jnp.log(jnp.sum(jnp.exp(shifted), axis=-1, keepdims=True))
    out_ref[...] = (shifted - lse).astype(out_ref.dtype)


@functools.partial(jax.jit, static_argnames=("block_b",))
def dan_forward(x, w1, b1, w2, b2, *, block_b=4096):
    """x: (B, d_embed) f32; w1: (d_embed, d_hidden); b1: (1, d_hidden);
    w2: (d_hidden, d_out); b2: (1, d_out). Returns (B, d_out) f32 log-probs."""
    B, d_embed = x.shape
    d_out = w2.shape[1]

    # --- Fold fc1 and fc2 (valid: no activation/BN/dropout between them in the
    #     default eval configuration). Done once in f32 at HIGHEST precision.
    hi = jax.lax.Precision.HIGHEST
    w = jnp.dot(w1, w2, precision=hi)           # (d_embed, d_out) f32
    b = jnp.dot(b1, w2, precision=hi) + b2      # (1, d_out)       f32

    # --- bf16 operands for the kernel GEMM (memory-bound kernel: halves HBM
    #     read bytes and VMEM tile footprint; accumulation stays in f32).
    x_bf = x.astype(jnp.bfloat16)
    w_bf = w.astype(jnp.bfloat16)

    # --- Batch tiling: no padded copy of x. Pallas handles a partial last
    #     block (reads in the padded region are unused garbage in independent
    #     rows; out-of-range output rows are dropped). Tile choice:
    #       (a) B is never rounded up by a whole extra tile,
    #       (b) >= 2 tiles when the batch is big enough so dimension_semantics
    #           ("parallel",) can shard across v7x's two TensorCores,
    #       (c) tile rows are a multiple of the bf16 sublane tile (16) unless a
    #           single tile covers the whole batch (full-dim block is legal).
    n_tiles = max(pl.cdiv(B, block_b), 2 if B >= 2 * _BF16_SUBLANE else 1)
    tb = _round_up(pl.cdiv(B, n_tiles), _BF16_SUBLANE)
    if tb >= B:
        tb = B
    grid = (pl.cdiv(B, tb),)

    cost = pl.CostEstimate(
        flops=2 * B * d_embed * d_out,
        transcendentals=B * d_out,
        bytes_accessed=(x_bf.size * 2 + w_bf.size * 2 + b.size * 4
                        + B * d_out * 4),
    )

    out = pl.pallas_call(
        dan_kernel,
        out_shape=jax.ShapeDtypeStruct((B, d_out), jnp.float32),
        grid=grid,
        in_specs=[
            # x tile: last dim equals full d_embed (unaligned-but-full is legal).
            pl.BlockSpec((tb, d_embed), lambda i: (i, 0)),
            # Folded weight: whole (d_embed, d_out) array, VMEM-resident.
            pl.BlockSpec((d_embed, d_out), lambda i: (0, 0)),
            # Folded bias row, VMEM-resident.
            pl.BlockSpec((1, d_out), lambda i: (0, 0)),
        ],
        # Narrow output: d_out masked lanes per store instead of a 128-wide
        # padded block that would be re-read and sliced afterwards.
        out_specs=pl.BlockSpec((tb, d_out), lambda i: (i, 0)),
        compiler_params=pltpu.CompilerParams(
            dimension_semantics=("parallel",),
        ),
        cost_estimate=cost,
    )(x_bf, w_bf, b)

    return out


def init_linear(key, d_in, d_out):
    """Deterministic PyTorch-style nn.Linear init: U(-1/sqrt(d_in), 1/sqrt(d_in)).
    Weight returned pre-transposed as (d_in, d_out)."""
    kw, kb = jax.random.split(key)
    bound = 1.0 / jnp.sqrt(jnp.float32(d_in))
    w = jax.random.uniform(kw, (d_in, d_out), jnp.float32, -bound, bound)
    b = jax.random.uniform(kb, (1, d_out), jnp.float32, -bound, bound)
    return w, b


if __name__ == "__main__":
    # Shapes consistent with the module defaults: fc1(50->256), fc2(256->2).
    # B=40 exercises a 2-tile grid plus a partial (masked) last batch block.
    B, d_embed, d_hidden, d_out = 40, 50, 256, 2

    key = jax.random.PRNGKey(0)
    kx, k1, k2 = jax.random.split(key, 3)

    x = jax.random.normal(kx, (B, d_embed), jnp.float32)
    w1, b1 = init_linear(k1, d_embed, d_hidden)
    w2, b2 = init_linear(k2, d_hidden, d_out)

    out = jax.block_until_ready(dan_forward(x, w1, b1, w2, b2))

    # Pure-JAX reference matching the PyTorch forward (two sequential Linears),
    # computed in f32 at HIGHEST precision.
    hi = jax.lax.Precision.HIGHEST
    ref_logits = jnp.dot(x, w1, precision=hi) + b1
    ref_logits = jnp.dot(ref_logits, w2, precision=hi) + b2
    ref = jax.nn.log_softmax(ref_logits, axis=1)

    assert out.shape == (B, d_out)
    # Kernel GEMM uses bf16 operands (same as MXU default-precision behavior),
    # so compare against the f32 reference with a correspondingly relaxed tol.
    assert jnp.allclose(out, ref, atol=3e-2, rtol=3e-2), "mismatch vs reference"

    print("KERNEL_OK")
</pallas_src>

<mosaic_0001>
module attributes {stable_mosaic.version = 11 : i64} {
  func.func @dan_kernel(%arg0: i32, %arg1: memref<32x50xbf16, #tpu.memory_space<vmem>>, %arg2: memref<50x2xbf16, #tpu.memory_space<vmem>>, %arg3: memref<1x2xf32, #tpu.memory_space<vmem>>, %arg4: memref<32x2xf32, #tpu.memory_space<vmem>>) attributes {dimension_semantics = [#tpu.dimension_semantics<parallel>], iteration_bounds = array<i64: 2>, scalar_prefetch = 0 : i64, scratch_operands = 0 : i64, tpu.core_type = #tpu.core_type<tc>, window_params = [{transform_indices = @transform_0, window_bounds = array<i64: 32, 50>}, {pipeline_mode = #tpu.pipeline_mode<synchronous>, transform_indices = @transform_1, window_bounds = array<i64: 50, 2>}, {pipeline_mode = #tpu.pipeline_mode<synchronous>, transform_indices = @transform_2, window_bounds = array<i64: 1, 2>}, {transform_indices = @transform_3, window_bounds = array<i64: 32, 2>}]} {
    %c0 = arith.constant 0 : index
    %c0_0 = arith.constant 0 : index
    %0 = vector.load %arg1[%c0, %c0_0] : memref<32x50xbf16, #tpu.memory_space<vmem>>, vector<32x50xbf16>
    %c0_1 = arith.constant 0 : index
    %c0_2 = arith.constant 0 : index
    %1 = vector.load %arg2[%c0_1, %c0_2] : memref<50x2xbf16, #tpu.memory_space<vmem>>, vector<50x2xbf16>
    %cst = arith.constant dense<0.000000e+00> : vector<32x2xf32>
    %2 = tpu.matmul %0, %1, %cst {dimension_numbers = #tpu.dot_dimension_numbers<[1], [0], [0], [1], [0, 0, 1, 1], [], []>} : vector<32x50xbf16>, vector<50x2xbf16>, vector<32x2xf32> -> vector<32x2xf32>
    %c0_3 = arith.constant 0 : index
    %c0_4 = arith.constant 0 : index
    %3 = vector.load %arg3[%c0_3, %c0_4] : memref<1x2xf32, #tpu.memory_space<vmem>>, vector<1x2xf32>
    %4 = vector.broadcast %3 : vector<1x2xf32> to vector<32x2xf32>
    %5 = arith.addf %2, %4 : vector<32x2xf32>
    %cst_5 = arith.constant dense<0xFF800000> : vector<32xf32>
    %6 = vector.multi_reduction <maximumf>, %5, %cst_5 [1] : vector<32x2xf32> to vector<32xf32>
    %7 = vector.shape_cast %6 : vector<32xf32> to vector<32x1xf32>
    %8 = vector.broadcast %7 : vector<32x1xf32> to vector<32x2xf32>
    %9 = arith.subf %5, %8 : vector<32x2xf32>
    %10 = math.exp %9 : vector<32x2xf32>
    %cst_6 = arith.constant dense<0.000000e+00> : vector<32xf32>
    %11 = vector.multi_reduction <add>, %10, %cst_6 [1] : vector<32x2xf32> to vector<32xf32>
    %12 = vector.shape_cast %11 : vector<32xf32> to vector<32x1xf32>
    %13 = math.log %12 : vector<32x1xf32>
    %14 = vector.broadcast %13 : vector<32x1xf32> to vector<32x2xf32>
    %15 = arith.subf %9, %14 : vector<32x2xf32>
    %c0_7 = arith.constant 0 : index
    %c0_8 = arith.constant 0 : index
    %16 = vector.load %arg4[%c0_7, %c0_8] : memref<32x2xf32, #tpu.memory_space<vmem>>, vector<32x2xf32>
    tpu.vector_store %arg4[%c0_7, %c0_8], %15 {strides = array<i32>} : memref<32x2xf32, #tpu.memory_space<vmem>>, vector<32x2xf32>,
    return
  }
  func.func @transform_0(%arg0: i32) -> (i32, i32) {
    %c0_i32 = arith.constant 0 : i32
    %c0_i32_0 = arith.constant 0 : i32
    return %arg0, %c0_i32 : i32, i32
  }
  func.func @transform_1(%arg0: i32) -> (i32, i32) {
    %c0_i32 = arith.constant 0 : i32
    %c0_i32_0 = arith.constant 0 : i32
    %c0_i32_1 = arith.constant 0 : i32
    return %c0_i32, %c0_i32_0 : i32, i32
  }
  func.func @transform_2(%arg0: i32) -> (i32, i32) {
    %c0_i32 = arith.constant 0 : i32
    %c0_i32_0 = arith.constant 0 : i32
    %c0_i32_1 = arith.constant 0 : i32
    return %c0_i32, %c0_i32_0 : i32, i32
  }
  func.func @transform_3(%arg0: i32) -> (i32, i32) {
    %c0_i32 = arith.constant 0 : i32
    %c0_i32_0 = arith.constant 0 : i32
    return %arg0, %c0_i32 : i32, i32
  }
}

</mosaic_0001>

<bundles_post_ra>
// kernel: dan_forward.1
= control target key start
LH: loop header
LB: loop body
LE: loop exit
PB: predicated region body
PF: predicated region fallthrough
CT: control target
= control target key end

     0   :  { %s821_s12 = smov 0   ;;  %s823_s13 = smov 0   ;;  %s948_s0 = inlined_call_operand.vmem [shape: bf16[40,50], index: 0, kind: input, shape index: {}]   ;;  %s949_s1 = inlined_call_operand.vmem [shape: bf16[50,2], index: 1, kind: input, shape index: {}]   ;;  %s950_s2 = inlined_call_operand.vmem [shape: f32[1,2], index: 2, kind: input, shape index: {}]   ;;  %s951_s3 = inlined_call_operand.vmem [shape: f32[40,2], index: 3, kind: output, shape index: {}]  }
   0x1   :  { %s825_s14 = smov 0  }
   0x2 LB: > { %s834_s15 = sadd.s32 4294967295, %s767_s14   ;;  %s836_s16 = sadd.s32 1, %s767_s14   ;;  %s767_s14 = sphi %s825_s14, %s958_s14   ;;  %s763_s13 = sphi %s823_s13, %s957_s13   ;;  %s759_s12 = sphi %s821_s12, %s956_s12  }
   0x3   : > { %s85_s17 = ssub.s32 %s767_s14, %s836_s16  ;;  %s88_s18 = sadd.s32 1, %s763_s13 }
   0x4   : > { %p86_p0 = scmp.eq.s32.totalorder %s85_s17, 0  ;;  %p98_p1 = scmp.ne.s32.totalorder %s763_s13, %s759_s12 }
   0x5   : > { %p99_p2 = scmp.eq.s32.totalorder %s834_s15, 1  ;;  %p553_p3 = scmp.ge.s32.totalorder %s767_s14, 1 }
   0x6   : > { %s844_s19 = scalar_select %p86_p0, %s763_s13, %s88_s18  }
   0x7   : > { %p846_p4 = por %p99_p2, %p98_p1  ;;  %p146_p5 = scmp.lt.s32.totalorder %s767_s14, 3 }
   0x9   : > { %p147_p6 = pnand %p553_p3, %p146_p5 }
   0xa   : > { %s854_s23 = sshll.u32 (!%p147_p6), %s834_s15, 2  ;;  %s170_s10 = sand.u32 (!%p147_p6), 1, %s759_s12  }
   0xb   : > { %150 = sbr.rel (%p147_p6) target bundleno = 470 (0x1d6), region = 32  ;;  %p178_p7 = scmp.lt.s32.totalorder (!%p147_p6), %s854_s23, 4 }
   0xc   : > { %s554_s11 = sshll.u32 (!%p147_p6), %s170_s10, 5 }
   0xd   : > { %s882_s14 = scalar_lea.vmem (!%p147_p6), [#allocation2], %s554_s11  }
  0x10   : > { %v203_v0 = vld [vmem:[%s949_s1 + $0x18] sm:$0x1]  ;;  %vm246_vm0 = vcmask 1040384   ;;  %v600_v4 = vld [vmem:[%s949_s1 + $0x10] sm:$0xff]  ;;  %s179_s26 = scalar_select %p178_p7, %s854_s23, 4  ;;  %v599_v5 = vld [vmem:[%s949_s1 + $0x8] sm:$0xff] }
  0x11   : > { %v231_v1 = vunpack.c.l.b16 %v203_v0  ;;  %v598_v6 = vld [vmem:[%s949_s1] sm:$0xff]  ;;  %vm239_vm1 = vcmask 408576   ;;  %vm269_vm2 = vcmask 15360   ;;  %s330_s12 = ssub.s32 (%p846_p4), 5, %s854_s23  ;;  %s601_s17 = sshll.u32 (%p846_p4), %s834_s15, 5 }
  0x12   : > { %s556_s29 = sshll.u32 %s179_s26, 2  ;;  %v696_v9 = vld [vmem:[%s950_s2] ss:$0 sm:$0xff]  ;;  %p331_p8 = scmp.lt.s32.totalorder (%p846_p4), %s330_s12, 4 }
  0x13   : > { %v235_v2 = vpack.c.b16 %v231_v1, %v231_v1  ;;  %s181_s7 = scalar_lea.vmem %s948_s0, %s556_s29  ;;  %s899_s22 = scalar_lea.vmem (%p846_p4), %s951_s3, %s601_s17  }
  0x14   : > { %v596_v7 = vld [vmem:[%s181_s7] sm:$0xff]  ;;  %v597_v8 = vld [vmem:[%s181_s7 + $0x8] sm:$0xff] }
  0x15   : > { %v248_v3 = vsel %vm246_vm0, %v235_v2, 0 }
  0x16   : > { %254 = vmatpush.bf16.msra.mxu0 %v248_v3  ;;  %604 = vmatpush.bf16.msra.mxu1 %v248_v3 }
  0x1a   : > { %255 = vmatpush.bf16.msra.mxu0 %v600_v4  ;;  %605 = vmatpush.bf16.msra.mxu1 %v600_v4 }
  0x1e   : > { %256 = vmatpush.bf16.msra.mxu0 %v599_v5  ;;  %606 = vmatpush.bf16.msra.mxu1 %v599_v5 }
  0x22   : > { %257 = vmatpush.bf16.msra.mxu0 %v598_v6  ;;  %607 = vmatpush.bf16.msra.mxu1 %v598_v6 }
  0x25   : > { %577 = vmatmul.msk.bf16.vlgmr.msra.gmra.mxu0 %vm239_vm1, %v596_v7  ;;  %578 = vmatmul.msk.bf16.vlgmr.msra.gmra.mxu1 %vm239_vm1, %v597_v8 }
  0xa2   : > { %v259_v10 = vpop.f32.mrf.mxu0  ;;  %v264_v11 = vpop.f32.mrf.mxu1 }
  0xa3   : > { %v260_v12 = vadd.f32 %v696_v9, %v259_v10  ;;  %v265_v13 = vadd.f32 %v696_v9, %v264_v11 }
  0xa5   : > { %v276_v14 = vsel %vm269_vm2, %v265_v13, -inf  ;;  %v270_v15 = vsel %vm269_vm2, %v260_v12, -inf }
  0xa6   : > { %277 = vmax.xlane.f32.xlu1 %v276_v14  ;;  %271 = vmax.xlane.f32.xlu0 %v270_v15 }
  0xaa   : > { %v261_v16 = vpop.f32.mrf.mxu0  ;;  %v266_v17 = vpop.f32.mrf.mxu1 }
  0xab   : > { %v262_v18 = vadd.f32 %v696_v9, %v261_v16  ;;  %v267_v19 = vadd.f32 %v696_v9, %v266_v17 }
  0xad   : > { %v279_v20 = vsel %vm269_vm2, %v267_v19, -inf  ;;  %v273_v21 = vsel %vm269_vm2, %v262_v18, -inf }
  0xae   : > { %280 = vmax.xlane.f32.xlu1 %v279_v20  ;;  %274 = vmax.xlane.f32.xlu0 %v273_v21 }
 0x119   : > { %v278_v22 = vpop.xlane.xlu1 %277  ;;  %v272_v23 = vpop.xlane.xlu0 %271 }
 0x11a   : > { %v284_v24 = vsub.f32 %v265_v13, %v278_v22  ;;  %v282_v25 = vsub.f32 %v260_v12, %v272_v23 }
 0x11c   : > { %v290_v26 = vmul.f32 1.442695, %v284_v24  ;;  %v286_v27 = vmul.f32 1.442695, %v282_v25 }
 0x11e   : > { %697 = vpow2.f32 %v290_v26 }
 0x11f   : > { %699 = vpow2.f32 %v286_v27 }
 0x121   : > { %v281_v28 = vpop.xlane.xlu1 %280  ;;  %v275_v29 = vpop.xlane.xlu0 %274 }
 0x122   : > { %v285_v30 = vsub.f32 %v267_v19, %v281_v28  ;;  %v283_v31 = vsub.f32 %v262_v18, %v275_v29 }
 0x124   : > { %v698_v32 = vpop.eup %697  ;;  %v292_v33 = vmul.f32 1.442695, %v285_v30  ;;  %v288_v34 = vmul.f32 1.442695, %v283_v31 }
 0x125   : > { %v700_v35 = vpop.eup %699  ;;  %v300_v36 = vsel %vm269_vm2, %v698_v32, 0.0 }
 0x126   : > { %701 = vpow2.f32 %v292_v33  ;;  %301 = vadd.xlane.f32.xlu0 %v300_v36  ;;  %v294_v37 = vsel %vm269_vm2, %v700_v35, 0.0 }
 0x127   : > { %703 = vpow2.f32 %v288_v34  ;;  %295 = vadd.xlane.f32.xlu2 %v294_v37 }
 0x12c   : > { %v702_v38 = vpop.eup %701 }
 0x12d   : > { %v704_v39 = vpop.eup %703  ;;  %v303_v40 = vsel %vm269_vm2, %v702_v38, 0.0 }
 0x12e   : > { %304 = vadd.xlane.f32.xlu1 %v303_v40  ;;  %v297_v41 = vsel %vm269_vm2, %v704_v39, 0.0 }
 0x12f   : > { %298 = vadd.xlane.f32.xlu2 %v297_v41 }
 0x199   : > { %v302_v42 = vpop.xlane.xlu0 %301 }
 0x19a   : > { %v296_v43 = vpop.xlane.xlu2 %295  ;;  %705 = vlog2.f32 %v302_v42 }
 0x19b   : > { %707 = vlog2.f32 %v296_v43 }
 0x1a0   : > { %v706_v44 = vpop.eup %705 }
 0x1a1   : > { %v708_v45 = vpop.eup %707  ;;  %v311_v46 = vmul.f32 0.6931472, %v706_v44  ;;  %v305_v47 = vpop.xlane.xlu1 %304 }
 0x1a2   : > { %v307_v48 = vmul.f32 0.6931472, %v708_v45  ;;  %709 = vlog2.f32 %v305_v47  ;;  %v299_v49 = vpop.xlane.xlu2 %298 }
 0x1a3   : > { %v316_v50 = vsub.f32 %v284_v24, %v311_v46  ;;  %711 = vlog2.f32 %v299_v49 }
 0x1a4   : > { %v314_v51 = vsub.f32 %v282_v25, %v307_v48 }
 0x1a5   : > { %320 = vst.msk [vmem:[%s882_s14 + $0x10] sm:$0xff] %vm269_vm2, %v316_v50 }
 0x1a6   : > { %318 = vst.msk [vmem:[%s882_s14] sm:$0xff] %vm269_vm2, %v314_v51 }
 0x1a8   : > { %v710_v52 = vpop.eup %709 }
 0x1a9   : > { %v712_v53 = vpop.eup %711  ;;  %v313_v54 = vmul.f32 0.6931472, %v710_v52 }
 0x1aa   : > { %v309_v55 = vmul.f32 0.6931472, %v712_v53  ;;  %328 = sbr.rel (!%p846_p4) target bundleno = 470 (0x1d6), region = 36 }
 0x1ab   : > { %v317_v56 = vsub.f32 %v285_v30, %v313_v54 }
 0x1ac   : > { %v315_v57 = vsub.f32 %v283_v31, %v309_v55 }
 0x1ad   : > { %321 = vst.msk [vmem:[%s882_s14 + $0x18] sm:$0xff] %vm269_vm2, %v317_v56 }
 0x1ae   : > { %319 = vst.msk [vmem:[%s882_s14 + $0x8] sm:$0xff] %vm269_vm2, %v315_v57 }
 0x1af   : > { %s960_s12 = smov (!%p331_p8, %s330_s12), 4 }
 0x1b0   : > { %s581_s24 = sshll.u32 %s960_s12, 3 }
 0x1b1   : > { %p584_p9 = scmp.eq.s32.totalorder %s581_s24, 0 }
 0x1b2   : > { %s905_s25 = sshrl.u32 (!%p584_p9), %s960_s12, 2 }
 0x1b3   : > { %339 = sbr.rel (%p584_p9) target bundleno = 470 (0x1d6), region = 40  ;;  %p585_p10 = scmp.le.s32.totalorder (!%p584_p9), %s905_s25, 0 }
 0x1b8   : > { %506 = sbr.rel (%p585_p10) target bundleno = 453 (0x1c5), region = 116  ;;  %s953_s15 = smov (!%p585_p10), %s899_s22 }
 0x1b9   : > { %s954_s20 = smov (!%p585_p10), %s882_s14  ;;  %s914_s23 = smov (!%p585_p10), 0  }
 0x1ba   : > { %s781_s26 = smov (!%p585_p10), 0  }
 0x1bd LB: >> { %v408_v58 = vld [vmem:[%s775_s20] sm:$0xff]  ;;  %v410_v59 = vld [vmem:[%s775_s20 + $0x8] sm:$0xff]  ;;  %v412_v60 = vld [vmem:[%s775_s20 + $0x10] sm:$0xff]  ;;  %s416_s27 = sadd.s32 1, %s779_s23  ;;  %s402_s26 = sadd.s32 1, %s783_s26   ;;  %s783_s26 = sphi %s781_s26, %s402_s26   ;;  %s779_s23 = sphi %s914_s23, %s955_s23   ;;  %s775_s20 = sphi %s954_s20, %s421_s20   ;;  %s771_s15 = sphi %s953_s15, %s422_s15  }
 0x1be   : >> { %409 = vst [vmem:[%s771_s15] sm:$0xff] %v408_v58  ;;  %v414_v61 = vld [vmem:[%s775_s20 + $0x18] sm:$0xff]  ;;  %p417_p11 = scmp.ge.s32.totalorder %s416_s27, %s905_s25  ;;  %p401_p12 = scmp.ge.s32.totalorder %s402_s26, %s905_s25 }
 0x1bf   : >> { %411 = vst [vmem:[%s771_s15 + $0x8] sm:$0xff] %v410_v59 }
 0x1c0   : >> { %413 = vst [vmem:[%s771_s15 + $0x10] sm:$0xff] %v412_v60  ;;  %s962_s27 = smov (%p417_p11, %s416_s27), 0  ;;  %404 = sbr.rel (!%p401_p12) target bundleno = 445 (0x1bd), region = 122 }
 0x1c1   : >> { %415 = vst [vmem:[%s771_s15 + $0x18] sm:$0xff] %v414_v61  ;;  %s586_s28 = sshll.u32 %s962_s27, 5  ;;  %s955_s23 = smov %s962_s27 }
 0x1c2   : >> { %s421_s20 = scalar_lea.vmem %s882_s14, %s586_s28 [#allocation2]   ;;  %s422_s15 = scalar_lea.vmem %s899_s22, %s586_s28  }
 0x1c5 PF: > { %s930_s29 = sand.u32 3, %s960_s12   ;;  %s602_s30 = sshll.u32 %s905_s25, 5 }
 0x1c6   : > { %s427_s4 = scalar_lea.vmem %s882_s14, %s602_s30 [#allocation2]   ;;  %s429_s5 = scalar_lea.vmem %s899_s22, %s602_s30  }
 0x1c7   : > { %p591_p13 = scmp.le.s32.totalorder %s930_s29, 0 }
 0x1c8   : > { %s785_s6 = smov (!%p591_p13), %s429_s5   ;;  %s789_s7 = smov (!%p591_p13), %s427_s4  }
 0x1c9   : > { %520 = sbr.rel (%p591_p13) target bundleno = 470 (0x1d6), region = 127  ;;  %s793_s8 = smov (!%p591_p13), 0  }
 0x1ca   : > { %s797_s9 = smov (!%p591_p13), 0  }
 0x1ce LB: >> { %v439_v62 = vld [vmem:[%s791_s7] sm:$0xff]  ;;  %s441_s10 = sadd.s32 1, %s795_s8  ;;  %s433_s9 = sadd.s32 1, %s799_s9   ;;  %s799_s9 = sphi %s797_s9, %s433_s9   ;;  %s795_s8 = sphi %s793_s8, %s794_s8   ;;  %s791_s7 = sphi %s789_s7, %s446_s7   ;;  %s787_s6 = sphi %s785_s6, %s447_s6  }
 0x1cf   : >> { %440 = vst [vmem:[%s787_s6] sm:$0xff] %v439_v62  ;;  %p442_p0 = scmp.ge.s32.totalorder %s441_s10, %s930_s29  ;;  %p432_p1 = scmp.ge.s32.totalorder %s433_s9, %s930_s29 }
 0x1d1   : >> { %s964_s10 = smov (%p442_p0, %s441_s10), 0  ;;  %435 = sbr.rel (!%p432_p1) target bundleno = 462 (0x1ce), region = 133 }
 0x1d2   : >> { %s592_s11 = sshll.u32 %s964_s10, 3  ;;  %s794_s8 = smov %s964_s10  }
 0x1d3   : >> { %s446_s7 = scalar_lea.vmem %s427_s4, %s592_s11 [#allocation2]   ;;  %s447_s6 = scalar_lea.vmem %s429_s5, %s592_s11  }
 0x1d6 PF: > { %p10_p2 = scmp.ge.s32.totalorder %s836_s16, 4   ;;  %s956_s12 = smov %s763_s13 }
 0x1d7   : > { %s957_s13 = smov %s844_s19  ;;  %s958_s14 = smov %s836_s16 }
 0x1d8   :  { %12 = sbr.rel (!%p10_p2) target bundleno = 2 (0x2), region = 144 }

</bundles_post_ra>
